<compile_context>
chip_gen: v7x
topology: tpu7x:2x2x1
jax: 0.10.0
libtpu: 0.0.40
codegen_flags: <defaults>
</compile_context>

<pallas_src>
import math

import jax
import jax.numpy as jnp
from jax.experimental import pallas as pl
from jax.experimental.pallas import tpu as pltpu

INPUT_DIM = 512     # hard-coded in the module
INNER_DIM = 512
NUM_CLASSES = 1
_LANE = 128         # lane-dense output width (pad num_classes up to this)


def _round_up(x, m):
    return (x + m - 1) // m * m


def _erf(z):
    # Abramowitz & Stegun 7.1.26 rational approximation, |err| < 1.5e-7
    # (float32-exact for our purposes).  The exp lands on the EUP slot; the
    # rest is VPU mul/add/select, all of which lower cleanly in Mosaic.
    a1 = 0.254829592
    a2 = -0.284496736
    a3 = 1.421413741
    a4 = -1.453152027
    a5 = 1.061405429
    p = 0.3275911
    sign = jnp.where(z >= 0.0, 1.0, -1.0)
    za = jnp.abs(z)
    t = 1.0 / (1.0 + p * za)
    poly = ((((a5 * t + a4) * t + a3) * t + a2) * t + a1) * t
    return sign * (1.0 - poly * jnp.exp(-za * za))


def _gelu_exact(x):
    # Matches PyTorch nn.GELU() default (erf form), not the tanh approximation.
    return 0.5 * x * (1.0 + _erf(x * 0.7071067811865476))


def _head_kernel(x_ref, w1_ref, b1_ref, w2_ref, b2_ref, out_ref):
    # x_ref : (TB, D)        bf16  CLS activations (batch tile)
    # w1_ref: (D, INNER)     bf16  dense weight (resident across grid steps)
    # b1_ref: (1, INNER)     f32   dense bias
    # w2_ref: (INNER, 128)   f32   out_proj weight, zero-padded past num_classes
    # b2_ref: (1,)           f32   out_proj bias (scalar, SMEM)
    # dropout(p=0.0) is the identity -> omitted.
    h = jnp.dot(x_ref[...], w1_ref[...],
                preferred_element_type=jnp.float32) + b1_ref[...]
    h = _gelu_exact(h)
    y = jnp.dot(h, w2_ref[...], preferred_element_type=jnp.float32) + b2_ref[0]
    out_ref[...] = y.astype(out_ref.dtype)


def unimol_head(encoder_rep, w_dense, b_dense, w_out, b_out, *, tb=256):
    """encoder_rep: [B, T, D] f32; weights stored [in, out]. Returns [B, C] f32."""
    B, T, D = encoder_rep.shape
    inner = w_dense.shape[1]
    C = w_out.shape[1]
    assert C == 1, "module hard-codes num_classes=1 (scalar out_proj bias path)"

    # Only the CLS token feeds the head: slice it in XLA so the kernel never
    # DMAs the full [B, T, D] encoder output.  bf16 halves input/weight DMA.
    x = encoder_rep[:, 0, :].astype(jnp.bfloat16)            # (B, D)
    w1 = w_dense.astype(jnp.bfloat16)                        # (D, inner)
    b1 = b_dense.reshape(1, inner).astype(jnp.float32)       # (1, inner)
    # Lane-dense output: pad out-projection to 128 columns (zeros past C).
    w2 = jnp.pad(w_out.astype(jnp.float32), ((0, 0), (0, _LANE - C)))
    b2 = b_out.reshape(C).astype(jnp.float32)                # scalar -> SMEM

    # Batch tiling: tile size multiple of 16 (bf16 sublane packing); the grid
    # axis is "parallel" so v7x's two TensorCores can split it.
    tb = max(16, min(int(tb), _round_up(B, 16)))
    b_pad = _round_up(B, tb)
    if b_pad != B:
        x = jnp.pad(x, ((0, b_pad - B), (0, 0)))

    flops = 2 * b_pad * D * inner + 2 * b_pad * inner * _LANE
    bytes_accessed = (b_pad * D * 2 + D * inner * 2 + inner * 4
                      + inner * _LANE * 4 + 4 + b_pad * _LANE * 4)

    out = pl.pallas_call(
        _head_kernel,
        out_shape=jax.ShapeDtypeStruct((b_pad, _LANE), jnp.float32),
        grid=(b_pad // tb,),
        in_specs=[
            pl.BlockSpec((tb, D), lambda i: (i, 0)),          # batch tile
            pl.BlockSpec((D, inner), lambda i: (0, 0)),       # resident weight
            pl.BlockSpec((1, inner), lambda i: (0, 0)),       # resident bias
            pl.BlockSpec((inner, _LANE), lambda i: (0, 0)),   # resident weight
            pl.BlockSpec(memory_space=pltpu.MemorySpace.SMEM),  # scalar bias
        ],
        out_specs=pl.BlockSpec((tb, _LANE), lambda i: (i, 0)),
        compiler_params=pltpu.CompilerParams(
            dimension_semantics=("parallel",)),
        cost_estimate=pl.CostEstimate(
            flops=flops,
            transcendentals=b_pad * inner,
            bytes_accessed=bytes_accessed),
    )(x, w1, b1, w2, b2)
    return out[:B, :C]


def init_params(key):
    """Deterministic init mimicking PyTorch nn.Linear defaults
    (uniform(-1/sqrt(fan_in), 1/sqrt(fan_in)))."""
    k1, k2, k3, k4 = jax.random.split(key, 4)
    bound1 = 1.0 / math.sqrt(INPUT_DIM)
    # PyTorch stores weights as [out, in]; transpose to [in, out] for the kernel.
    w_dense_pt = jax.random.uniform(
        k1, (INNER_DIM, INPUT_DIM), jnp.float32, -bound1, bound1)
    b_dense = jax.random.uniform(
        k2, (INNER_DIM,), jnp.float32, -bound1, bound1)
    bound2 = 1.0 / math.sqrt(INNER_DIM)
    w_out_pt = jax.random.uniform(
        k3, (NUM_CLASSES, INNER_DIM), jnp.float32, -bound2, bound2)
    b_out = jax.random.uniform(
        k4, (NUM_CLASSES,), jnp.float32, -bound2, bound2)
    return (jnp.transpose(w_dense_pt), b_dense,
            jnp.transpose(w_out_pt), b_out)


if __name__ == "__main__":
    key = jax.random.PRNGKey(0)
    k_er, k_params = jax.random.split(key)

    # Small, module-consistent shapes: batch=2, seq=8 (atoms + special tokens),
    # hidden=512 (the head's input_dim is fixed at 512 by the module).
    B, T, D = 2, 8, INPUT_DIM
    encoder_rep = jax.random.normal(k_er, (B, T, D), dtype=jnp.float32)
    w_dense, b_dense, w_out, b_out = init_params(k_params)

    head = jax.jit(unimol_head)
    out = jax.block_until_ready(head(encoder_rep, w_dense, b_dense, w_out, b_out))
    assert out.shape == (B, NUM_CLASSES), out.shape

    x = encoder_rep[:, 0, :]

    # Reference 1: mirrors the kernel's mixed precision (bf16 MXU inputs,
    # f32 accumulation) -> tight tolerance.
    h_bf = jnp.dot(x.astype(jnp.bfloat16), w_dense.astype(jnp.bfloat16),
                   preferred_element_type=jnp.float32) + b_dense.reshape(1, -1)
    g_bf = 0.5 * h_bf * (1.0 + jax.scipy.special.erf(h_bf / jnp.sqrt(2.0)))
    ref_bf = jnp.dot(g_bf, w_out) + b_out.reshape(1, -1)
    assert jnp.allclose(out, ref_bf, atol=1e-4, rtol=1e-4), (out, ref_bf)

    # Reference 2: full-f32 PyTorch-equivalent head (dropout p=0 -> identity);
    # looser tolerance accounts only for the bf16 cast of the first matmul.
    h = jnp.dot(x, w_dense) + b_dense.reshape(1, -1)
    g = 0.5 * h * (1.0 + jax.scipy.special.erf(h / jnp.sqrt(2.0)))
    ref = jnp.dot(g, w_out) + b_out.reshape(1, -1)
    assert jnp.allclose(out, ref, atol=2e-2, rtol=2e-2), (out, ref)

    print("KERNEL_OK")
</pallas_src>

<mosaic_0001>
module attributes {stable_mosaic.version = 11 : i64} {
  func.func @_head_kernel(%arg0: i32, %arg1: memref<16x512xbf16, #tpu.memory_space<vmem>>, %arg2: memref<512x512xbf16, #tpu.memory_space<vmem>>, %arg3: memref<1x512xf32, #tpu.memory_space<vmem>>, %arg4: memref<512x128xf32, #tpu.memory_space<vmem>>, %arg5: memref<1xf32, #tpu.memory_space<smem>>, %arg6: memref<16x128xf32, #tpu.memory_space<vmem>>) attributes {dimension_semantics = [#tpu.dimension_semantics<parallel>], iteration_bounds = array<i64: 1>, scalar_prefetch = 0 : i64, scratch_operands = 0 : i64, tpu.core_type = #tpu.core_type<tc>, window_params = [{transform_indices = @transform_0, window_bounds = array<i64: 16, 512>}, {pipeline_mode = #tpu.pipeline_mode<synchronous>, transform_indices = @transform_1, window_bounds = array<i64: 512, 512>}, {pipeline_mode = #tpu.pipeline_mode<synchronous>, transform_indices = @transform_2, window_bounds = array<i64: 1, 512>}, {pipeline_mode = #tpu.pipeline_mode<synchronous>, transform_indices = @transform_3, window_bounds = array<i64: 512, 128>}, {transform_indices = @transform_4, window_bounds = array<i64: 1>}, {transform_indices = @transform_5, window_bounds = array<i64: 16, 128>}]} {
    %c0 = arith.constant 0 : index
    %c0_0 = arith.constant 0 : index
    %0 = vector.load %arg1[%c0, %c0_0] : memref<16x512xbf16, #tpu.memory_space<vmem>>, vector<16x512xbf16>
    %c0_1 = arith.constant 0 : index
    %c0_2 = arith.constant 0 : index
    %1 = vector.load %arg2[%c0_1, %c0_2] : memref<512x512xbf16, #tpu.memory_space<vmem>>, vector<512x512xbf16>
    %cst = arith.constant dense<0.000000e+00> : vector<16x512xf32>
    %2 = tpu.matmul %0, %1, %cst {dimension_numbers = #tpu.dot_dimension_numbers<[1], [0], [0], [1], [0, 0, 1, 1], [], []>} : vector<16x512xbf16>, vector<512x512xbf16>, vector<16x512xf32> -> vector<16x512xf32>
    %c0_3 = arith.constant 0 : index
    %c0_4 = arith.constant 0 : index
    %3 = vector.load %arg3[%c0_3, %c0_4] : memref<1x512xf32, #tpu.memory_space<vmem>>, vector<1x512xf32>
    %4 = vector.broadcast %3 : vector<1x512xf32> to vector<16x512xf32>
    %5 = arith.addf %2, %4 : vector<16x512xf32>
    %cst_5 = arith.constant 5.000000e-01 : f32
    %6 = vector.broadcast %cst_5 : f32 to vector<16x512xf32>
    %7 = arith.mulf %6, %5 : vector<16x512xf32>
    %cst_6 = arith.constant 0.707106769 : f32
    %8 = vector.broadcast %cst_6 : f32 to vector<16x512xf32>
    %9 = arith.mulf %5, %8 : vector<16x512xf32>
    %cst_7 = arith.constant 0.000000e+00 : f32
    %10 = vector.broadcast %cst_7 : f32 to vector<16x512xf32>
    %11 = arith.cmpf oge, %9, %10 : vector<16x512xf32>
    %cst_8 = arith.constant 1.000000e+00 : f32
    %cst_9 = arith.constant -1.000000e+00 : f32
    %12 = vector.broadcast %cst_8 : f32 to vector<16x512xf32>
    %13 = vector.broadcast %cst_9 : f32 to vector<16x512xf32>
    %14 = arith.select %11, %12, %13 : vector<16x512xi1>, vector<16x512xf32>
    %15 = math.absf %9 : vector<16x512xf32>
    %cst_10 = arith.constant 0.327591091 : f32
    %16 = vector.broadcast %cst_10 : f32 to vector<16x512xf32>
    %17 = arith.mulf %16, %15 : vector<16x512xf32>
    %cst_11 = arith.constant 1.000000e+00 : f32
    %18 = vector.broadcast %cst_11 : f32 to vector<16x512xf32>
    %19 = arith.addf %18, %17 : vector<16x512xf32>
    %cst_12 = arith.constant 1.000000e+00 : f32
    %20 = vector.broadcast %cst_12 : f32 to vector<16x512xf32>
    %21 = arith.divf %20, %19 : vector<16x512xf32>
    %cst_13 = arith.constant 1.06140542 : f32
    %22 = vector.broadcast %cst_13 : f32 to vector<16x512xf32>
    %23 = arith.mulf %22, %21 : vector<16x512xf32>
    %cst_14 = arith.constant -1.45315206 : f32
    %24 = vector.broadcast %cst_14 : f32 to vector<16x512xf32>
    %25 = arith.addf %23, %24 : vector<16x512xf32>
    %26 = arith.mulf %25, %21 : vector<16x512xf32>
    %cst_15 = arith.constant 1.42141378 : f32
    %27 = vector.broadcast %cst_15 : f32 to vector<16x512xf32>
    %28 = arith.addf %26, %27 : vector<16x512xf32>
    %29 = arith.mulf %28, %21 : vector<16x512xf32>
    %cst_16 = arith.constant -0.284496725 : f32
    %30 = vector.broadcast %cst_16 : f32 to vector<16x512xf32>
    %31 = arith.addf %29, %30 : vector<16x512xf32>
    %32 = arith.mulf %31, %21 : vector<16x512xf32>
    %cst_17 = arith.constant 0.254829586 : f32
    %33 = vector.broadcast %cst_17 : f32 to vector<16x512xf32>
    %34 = arith.addf %32, %33 : vector<16x512xf32>
    %35 = arith.mulf %34, %21 : vector<16x512xf32>
    %cst_18 = arith.constant 0.000000e+00 : f32
    %36 = vector.broadcast %cst_18 : f32 to vector<16x512xf32>
    %37 = arith.subf %36, %15 : vector<16x512xf32>
    %38 = arith.mulf %37, %15 : vector<16x512xf32>
    %39 = math.exp %38 : vector<16x512xf32>
    %40 = arith.mulf %35, %39 : vector<16x512xf32>
    %cst_19 = arith.constant 1.000000e+00 : f32
    %41 = vector.broadcast %cst_19 : f32 to vector<16x512xf32>
    %42 = arith.subf %41, %40 : vector<16x512xf32>
    %43 = arith.mulf %14, %42 : vector<16x512xf32>
    %cst_20 = arith.constant 1.000000e+00 : f32
    %44 = vector.broadcast %cst_20 : f32 to vector<16x512xf32>
    %45 = arith.addf %44, %43 : vector<16x512xf32>
    %46 = arith.mulf %7, %45 : vector<16x512xf32>
    %c0_21 = arith.constant 0 : index
    %c0_22 = arith.constant 0 : index
    %47 = vector.load %arg4[%c0_21, %c0_22] : memref<512x128xf32, #tpu.memory_space<vmem>>, vector<512x128xf32>
    %cst_23 = arith.constant dense<0.000000e+00> : vector<16x128xf32>
    %48 = tpu.matmul %46, %47, %cst_23 {dimension_numbers = #tpu.dot_dimension_numbers<[1], [0], [0], [1], [0, 0, 1, 1], [], []>} : vector<16x512xf32>, vector<512x128xf32>, vector<16x128xf32> -> vector<16x128xf32>
    %c0_24 = arith.constant 0 : index
    %49 = memref.load %arg5[%c0_24] : memref<1xf32, #tpu.memory_space<smem>>
    %50 = vector.broadcast %49 : f32 to vector<16x128xf32>
    %51 = arith.addf %48, %50 : vector<16x128xf32>
    %c0_25 = arith.constant 0 : index
    %c0_26 = arith.constant 0 : index
    %52 = vector.load %arg6[%c0_25, %c0_26] : memref<16x128xf32, #tpu.memory_space<vmem>>, vector<16x128xf32>
    tpu.vector_store %arg6[%c0_25, %c0_26], %51 {strides = array<i32>} : memref<16x128xf32, #tpu.memory_space<vmem>>, vector<16x128xf32>,
    return
  }
  func.func @transform_0(%arg0: i32) -> (i32, i32) {
    %c0_i32 = arith.constant 0 : i32
    %c0_i32_0 = arith.constant 0 : i32
    return %arg0, %c0_i32 : i32, i32
  }
  func.func @transform_1(%arg0: i32) -> (i32, i32) {
    %c0_i32 = arith.constant 0 : i32
    %c0_i32_0 = arith.constant 0 : i32
    %c0_i32_1 = arith.constant 0 : i32
    return %c0_i32, %c0_i32_0 : i32, i32
  }
  func.func @transform_2(%arg0: i32) -> (i32, i32) {
    %c0_i32 = arith.constant 0 : i32
    %c0_i32_0 = arith.constant 0 : i32
    %c0_i32_1 = arith.constant 0 : i32
    return %c0_i32, %c0_i32_0 : i32, i32
  }
  func.func @transform_3(%arg0: i32) -> (i32, i32) {
    %c0_i32 = arith.constant 0 : i32
    %c0_i32_0 = arith.constant 0 : i32
    %c0_i32_1 = arith.constant 0 : i32
    return %c0_i32, %c0_i32_0 : i32, i32
  }
  func.func @transform_4(%arg0: i32) -> i32 {
    %c0_i32 = arith.constant 0 : i32
    %c0_i32_0 = arith.constant 0 : i32
    return %c0_i32 : i32
  }
  func.func @transform_5(%arg0: i32) -> (i32, i32) {
    %c0_i32 = arith.constant 0 : i32
    %c0_i32_0 = arith.constant 0 : i32
    return %arg0, %c0_i32 : i32, i32
  }
}

</mosaic_0001>

<bundles_post_ra>
// kernel: unimol_head.1
= control target key start
LH: loop header
LB: loop body
LE: loop exit
PB: predicated region body
PF: predicated region fallthrough
CT: control target
= control target key end

     0   :  { %s2729_s1 = inlined_call_operand.vmem [shape: bf16[512,512], index: 1, kind: input, shape index: {}]   ;;  %s2730_s0 = inlined_call_operand.vmem [shape: bf16[16,512], index: 0, kind: input, shape index: {}]   ;;  %s2731_s3 = inlined_call_operand.vmem [shape: f32[512,128], index: 3, kind: input, shape index: {}]   ;;  %s2732_s2 = inlined_call_operand.vmem [shape: f32[1,512], index: 2, kind: input, shape index: {}]   ;;  %s2733_s4 = inlined_call_operand.<no memory space> [shape: f32[1], index: 4, kind: input, shape index: {}]   ;;  %s2734_s5 = inlined_call_operand.vmem [shape: f32[16,128], index: 5, kind: output, shape index: {}]  }
   0x1   :  { %v1734_v0 = vld [vmem:[%s2729_s1 + $0x4] ss:$16 sps:$4 sm:$0xff]   ;;  %v1736_v1 = vld [vmem:[%s2729_s1 + $0xc] ss:$16 sps:$4 sm:$0xff]   ;;  %v1738_v2 = vld [vmem:[%s2729_s1] ss:$16 sps:$4 sm:$0xff]  }
   0x2   :  { %835 = vmatprep.subr.bf16.mxu0 %v1734_v0  ;;  %v1739_v3 = vld [vmem:[%s2729_s1 + $0x8] ss:$16 sps:$4 sm:$0xff]   ;;  %921 = vmatprep.subr.bf16.mxu1 %v1736_v1  ;;  %v1740_v4 = vld [vmem:[%s2729_s1 + $0x24] ss:$16 sps:$4 sm:$0xff]   ;;  %v1742_v5 = vld [vmem:[%s2729_s1 + $0x2c] ss:$16 sps:$4 sm:$0xff]  }
   0x3   :  { %836 = vmatpush1.bf16.msra.mxu0 %v1738_v2  ;;  %922 = vmatpush1.bf16.msra.mxu1 %v1739_v3  ;;  %v1744_v6 = vld [vmem:[%s2729_s1 + $0x20] ss:$16 sps:$4 sm:$0xff]   ;;  %v1745_v7 = vld [vmem:[%s2729_s1 + $0x28] ss:$16 sps:$4 sm:$0xff]   ;;  %v1746_v8 = vld [vmem:[%s2729_s1 + $0x44] ss:$16 sps:$4 sm:$0xff]  }
   0x4   :  { %837 = vmatprep.subr.bf16.mxu0 %v1740_v4  ;;  %923 = vmatprep.subr.bf16.mxu1 %v1742_v5  ;;  %v1748_v9 = vld [vmem:[%s2729_s1 + $0x4c] ss:$16 sps:$4 sm:$0xff]   ;;  %v1750_v10 = vld [vmem:[%s2729_s1 + $0x40] ss:$16 sps:$4 sm:$0xff]   ;;  %v1751_v11 = vld [vmem:[%s2729_s1 + $0x48] ss:$16 sps:$4 sm:$0xff]  }
   0x5   :  { %v1752_v12 = vld [vmem:[%s2729_s1 + $0x64] ss:$16 sps:$4 sm:$0xff]   ;;  %v1754_v13 = vld [vmem:[%s2729_s1 + $0x6c] ss:$16 sps:$4 sm:$0xff]   ;;  %v1756_v14 = vld [vmem:[%s2729_s1 + $0x60] ss:$16 sps:$4 sm:$0xff]  }
   0x6   :  { %v1757_v15 = vld [vmem:[%s2729_s1 + $0x68] ss:$16 sps:$4 sm:$0xff]   ;;  %v1758_v16 = vld [vmem:[%s2729_s1 + $0x84] ss:$16 sps:$4 sm:$0xff]   ;;  %v1760_v17 = vld [vmem:[%s2729_s1 + $0x8c] ss:$16 sps:$4 sm:$0xff]  }
   0x7   :  { %838 = vmatpush1.bf16.msra.mxu0 %v1744_v6  ;;  %924 = vmatpush1.bf16.msra.mxu1 %v1745_v7  ;;  %v1762_v18 = vld [vmem:[%s2729_s1 + $0x80] ss:$16 sps:$4 sm:$0xff]   ;;  %v1763_v19 = vld [vmem:[%s2729_s1 + $0x88] ss:$16 sps:$4 sm:$0xff]   ;;  %v1764_v20 = vld [vmem:[%s2729_s1 + $0xa4] ss:$16 sps:$4 sm:$0xff]  }
   0x8   :  { %839 = vmatprep.subr.bf16.mxu0 %v1746_v8  ;;  %925 = vmatprep.subr.bf16.mxu1 %v1748_v9  ;;  %v1766_v21 = vld [vmem:[%s2729_s1 + $0xac] ss:$16 sps:$4 sm:$0xff]   ;;  %v1768_v22 = vld [vmem:[%s2729_s1 + $0xa0] ss:$16 sps:$4 sm:$0xff]   ;;  %v1769_v23 = vld [vmem:[%s2729_s1 + $0xa8] ss:$16 sps:$4 sm:$0xff]  }
   0x9   :  { %v1770_v24 = vld [vmem:[%s2729_s1 + $0xc4] ss:$16 sps:$4 sm:$0xff]   ;;  %v1772_v25 = vld [vmem:[%s2729_s1 + $0xcc] ss:$16 sps:$4 sm:$0xff]   ;;  %v1774_v26 = vld [vmem:[%s2729_s1 + $0xc0] ss:$16 sps:$4 sm:$0xff]  }
   0xa   :  { %v1775_v27 = vld [vmem:[%s2729_s1 + $0xc8] ss:$16 sps:$4 sm:$0xff]   ;;  %v1776_v28 = vld [vmem:[%s2729_s1 + $0xe4] ss:$16 sps:$4 sm:$0xff]   ;;  %v1778_v29 = vld [vmem:[%s2729_s1 + $0xec] ss:$16 sps:$4 sm:$0xff]  }
   0xb   :  { %840 = vmatpush1.bf16.msra.mxu0 %v1750_v10  ;;  %926 = vmatpush1.bf16.msra.mxu1 %v1751_v11  ;;  %v1780_v30 = vld [vmem:[%s2729_s1 + $0xe0] ss:$16 sps:$4 sm:$0xff]   ;;  %v1781_v31 = vld [vmem:[%s2729_s1 + $0xe8] ss:$16 sps:$4 sm:$0xff]   ;;  %v1782_v32 = vld [vmem:[%s2729_s1 + $0x104] ss:$16 sps:$4 sm:$0xff]  }
   0xc   :  { %841 = vmatprep.subr.bf16.mxu0 %v1752_v12  ;;  %927 = vmatprep.subr.bf16.mxu1 %v1754_v13  ;;  %v1784_v33 = vld [vmem:[%s2729_s1 + $0x10c] ss:$16 sps:$4 sm:$0xff]   ;;  %v1786_v34 = vld [vmem:[%s2729_s1 + $0x100] ss:$16 sps:$4 sm:$0xff]   ;;  %v1787_v35 = vld [vmem:[%s2729_s1 + $0x108] ss:$16 sps:$4 sm:$0xff]  }
   0xd   :  { %v1788_v36 = vld [vmem:[%s2729_s1 + $0x124] ss:$16 sps:$4 sm:$0xff]   ;;  %v1790_v37 = vld [vmem:[%s2729_s1 + $0x12c] ss:$16 sps:$4 sm:$0xff]   ;;  %v1792_v38 = vld [vmem:[%s2729_s1 + $0x120] ss:$16 sps:$4 sm:$0xff]  }
   0xe   :  { %v1793_v39 = vld [vmem:[%s2729_s1 + $0x128] ss:$16 sps:$4 sm:$0xff]   ;;  %v1794_v40 = vld [vmem:[%s2729_s1 + $0x144] ss:$16 sps:$4 sm:$0xff]   ;;  %v1796_v41 = vld [vmem:[%s2729_s1 + $0x14c] ss:$16 sps:$4 sm:$0xff]  }
   0xf   :  { %842 = vmatpush1.bf16.msra.mxu0 %v1756_v14  ;;  %928 = vmatpush1.bf16.msra.mxu1 %v1757_v15  ;;  %v1798_v42 = vld [vmem:[%s2729_s1 + $0x140] ss:$16 sps:$4 sm:$0xff]   ;;  %v1799_v43 = vld [vmem:[%s2729_s1 + $0x148] ss:$16 sps:$4 sm:$0xff]   ;;  %v1800_v44 = vld [vmem:[%s2729_s1 + $0x164] ss:$16 sps:$4 sm:$0xff]  }
  0x10   :  { %843 = vmatprep.subr.bf16.mxu0 %v1758_v16  ;;  %929 = vmatprep.subr.bf16.mxu1 %v1760_v17  ;;  %v1802_v45 = vld [vmem:[%s2729_s1 + $0x16c] ss:$16 sps:$4 sm:$0xff]   ;;  %v1804_v46 = vld [vmem:[%s2729_s1 + $0x160] ss:$16 sps:$4 sm:$0xff]   ;;  %v1805_v47 = vld [vmem:[%s2729_s1 + $0x168] ss:$16 sps:$4 sm:$0xff]  }
  0x11   :  { %v1832_v48 = vld [vmem:[%s2730_s0 + $0x4] ss:$16 sps:$4 sm:$0xff]   ;;  %v1808_v50 = vld [vmem:[%s2729_s1 + $0x18c] ss:$16 sps:$4 sm:$0xff]   ;;  %v1810_v51 = vld [vmem:[%s2729_s1 + $0x180] ss:$16 sps:$4 sm:$0xff]  }
  0x12   :  { %v1806_v49 = vld [vmem:[%s2729_s1 + $0x184] ss:$16 sps:$4 sm:$0xff]   ;;  %867 = vmatprep.mubr.bf16.mxu0 %v1832_v48  ;;  %953 = vmatprep.mubr.bf16.mxu1 %v1832_v48  ;;  %v1811_v52 = vld [vmem:[%s2729_s1 + $0x188] ss:$16 sps:$4 sm:$0xff]   ;;  %v1814_v54 = vld [vmem:[%s2729_s1 + $0x1ac] ss:$16 sps:$4 sm:$0xff]  }
  0x13   :  { %844 = vmatpush1.bf16.msra.mxu0 %v1762_v18  ;;  %930 = vmatpush1.bf16.msra.mxu1 %v1763_v19  ;;  %v1812_v53 = vld [vmem:[%s2729_s1 + $0x1a4] ss:$16 sps:$4 sm:$0xff]   ;;  %v1816_v55 = vld [vmem:[%s2729_s1 + $0x1a0] ss:$16 sps:$4 sm:$0xff]   ;;  %v1817_v56 = vld [vmem:[%s2729_s1 + $0x1a8] ss:$16 sps:$4 sm:$0xff]  }
  0x14   :  { %845 = vmatprep.subr.bf16.mxu0 %v1764_v20  ;;  %931 = vmatprep.subr.bf16.mxu1 %v1766_v21  ;;  %v1818_v57 = vld [vmem:[%s2729_s1 + $0x1c4] ss:$16 sps:$4 sm:$0xff]   ;;  %v1820_v58 = vld [vmem:[%s2729_s1 + $0x1cc] ss:$16 sps:$4 sm:$0xff]   ;;  %v1822_v59 = vld [vmem:[%s2729_s1 + $0x1c0] ss:$16 sps:$4 sm:$0xff]  }
  0x15   :  { %v1823_v60 = vld [vmem:[%s2729_s1 + $0x1c8] ss:$16 sps:$4 sm:$0xff]   ;;  %v1824_v61 = vld [vmem:[%s2729_s1 + $0x1e4] ss:$16 sps:$4 sm:$0xff]   ;;  %v1826_v62 = vld [vmem:[%s2729_s1 + $0x1ec] ss:$16 sps:$4 sm:$0xff]  }
  0x16   :  { %v1828_v63 = vld [vmem:[%s2729_s1 + $0x1e0] ss:$16 sps:$4 sm:$0xff]   ;;  %v1829_v0 = vld [vmem:[%s2729_s1 + $0x1e8] ss:$16 sps:$4 sm:$0xff]   ;;  %v1835_v1 = vld [vmem:[%s2729_s1 + $0x204] ss:$16 sps:$4 sm:$0xff]  }
  0x17   :  { %846 = vmatpush1.bf16.msra.mxu0 %v1768_v22  ;;  %932 = vmatpush1.bf16.msra.mxu1 %v1769_v23  ;;  %v1838_v2 = vld [vmem:[%s2729_s1 + $0x20c] ss:$16 sps:$4 sm:$0xff]   ;;  %v1830_v3 = vld [vmem:[%s2730_s0] ss:$16 sps:$4 sm:$0xff]   ;;  %v1836_v5 = vld [vmem:[%s2729_s1 + $0x208] ss:$16 sps:$4 sm:$0xff]  }
  0x18   :  { %847 = vmatprep.subr.bf16.mxu0 %v1770_v24  ;;  %933 = vmatprep.subr.bf16.mxu1 %v1772_v25  ;;  %v1833_v4 = vld [vmem:[%s2729_s1 + $0x200] ss:$16 sps:$4 sm:$0xff]   ;;  %v1841_v6 = vld [vmem:[%s2729_s1 + $0x224] ss:$16 sps:$4 sm:$0xff]   ;;  %v1844_v7 = vld [vmem:[%s2729_s1 + $0x22c] ss:$16 sps:$4 sm:$0xff]  }
  0x19   :  { %v1839_v8 = vld [vmem:[%s2729_s1 + $0x220] ss:$16 sps:$4 sm:$0xff]   ;;  %v1842_v9 = vld [vmem:[%s2729_s1 + $0x228] ss:$16 sps:$4 sm:$0xff]   ;;  %v1847_v10 = vld [vmem:[%s2729_s1 + $0x244] ss:$16 sps:$4 sm:$0xff]  }
  0x1a   :  { %v1850_v11 = vld [vmem:[%s2729_s1 + $0x24c] ss:$16 sps:$4 sm:$0xff]   ;;  %v1845_v12 = vld [vmem:[%s2729_s1 + $0x240] ss:$16 sps:$4 sm:$0xff]   ;;  %v1848_v13 = vld [vmem:[%s2729_s1 + $0x248] ss:$16 sps:$4 sm:$0xff]  }
  0x1b   :  { %848 = vmatpush1.bf16.msra.mxu0 %v1774_v26  ;;  %934 = vmatpush1.bf16.msra.mxu1 %v1775_v27  ;;  %v1853_v14 = vld [vmem:[%s2729_s1 + $0x264] ss:$16 sps:$4 sm:$0xff]   ;;  %v1856_v15 = vld [vmem:[%s2729_s1 + $0x26c] ss:$16 sps:$4 sm:$0xff]   ;;  %v1851_v16 = vld [vmem:[%s2729_s1 + $0x260] ss:$16 sps:$4 sm:$0xff]  }
  0x1c   :  { %849 = vmatprep.subr.bf16.mxu0 %v1776_v28  ;;  %935 = vmatprep.subr.bf16.mxu1 %v1778_v29  ;;  %v1854_v17 = vld [vmem:[%s2729_s1 + $0x268] ss:$16 sps:$4 sm:$0xff]   ;;  %v1859_v18 = vld [vmem:[%s2729_s1 + $0x284] ss:$16 sps:$4 sm:$0xff]   ;;  %v1862_v19 = vld [vmem:[%s2729_s1 + $0x28c] ss:$16 sps:$4 sm:$0xff]  }
  0x1d   :  { %v1857_v20 = vld [vmem:[%s2729_s1 + $0x280] ss:$16 sps:$4 sm:$0xff]   ;;  %v1860_v21 = vld [vmem:[%s2729_s1 + $0x288] ss:$16 sps:$4 sm:$0xff]   ;;  %v1865_v22 = vld [vmem:[%s2729_s1 + $0x2a4] ss:$16 sps:$4 sm:$0xff]  }
  0x1e   :  { %v1868_v23 = vld [vmem:[%s2729_s1 + $0x2ac] ss:$16 sps:$4 sm:$0xff]   ;;  %v1863_v24 = vld [vmem:[%s2729_s1 + $0x2a0] ss:$16 sps:$4 sm:$0xff]   ;;  %v1866_v25 = vld [vmem:[%s2729_s1 + $0x2a8] ss:$16 sps:$4 sm:$0xff]  }
  0x1f   :  { %850 = vmatpush1.bf16.msra.mxu0 %v1780_v30  ;;  %936 = vmatpush1.bf16.msra.mxu1 %v1781_v31  ;;  %v1871_v26 = vld [vmem:[%s2729_s1 + $0x2c4] ss:$16 sps:$4 sm:$0xff]   ;;  %v1874_v27 = vld [vmem:[%s2729_s1 + $0x2cc] ss:$16 sps:$4 sm:$0xff]   ;;  %v1869_v29 = vld [vmem:[%s2729_s1 + $0x2c0] ss:$16 sps:$4 sm:$0xff]  }
  0x20   :  { %851 = vmatprep.subr.bf16.mxu0 %v1782_v32  ;;  %937 = vmatprep.subr.bf16.mxu1 %v1784_v33  ;;  %v1931_v28 = vld [vmem:[%s2730_s0 + $0xc] ss:$16 sps:$4 sm:$0xff]   ;;  %v1872_v30 = vld [vmem:[%s2729_s1 + $0x2c8] ss:$16 sps:$4 sm:$0xff]   ;;  %v1877_v31 = vld [vmem:[%s2729_s1 + $0x2e4] ss:$16 sps:$4 sm:$0xff]  }
  0x21   :  { %v1880_v32 = vld [vmem:[%s2729_s1 + $0x2ec] ss:$16 sps:$4 sm:$0xff]   ;;  %v1875_v33 = vld [vmem:[%s2729_s1 + $0x2e0] ss:$16 sps:$4 sm:$0xff]  }
  0x22   :  { %v1904_v48 = vld [vmem:[%s2729_s1 + $0x36c] ss:$16 sps:$4 sm:$0xff]  }
  0x23   :  { %852 = vmatpush1.bf16.msra.mxu0 %v1786_v34  ;;  %938 = vmatpush1.bf16.msra.mxu1 %v1787_v35  ;;  %v1878_v34 = vld [vmem:[%s2729_s1 + $0x2e8] ss:$16 sps:$4 sm:$0xff]   ;;  %v1883_v35 = vld [vmem:[%s2729_s1 + $0x304] ss:$16 sps:$4 sm:$0xff]  }
  0x24   :  { %853 = vmatprep.subr.bf16.mxu0 %v1788_v36  ;;  %939 = vmatprep.subr.bf16.mxu1 %v1790_v37  ;;  %v1886_v36 = vld [vmem:[%s2729_s1 + $0x30c] ss:$16 sps:$4 sm:$0xff]   ;;  %v1881_v37 = vld [vmem:[%s2729_s1 + $0x300] ss:$16 sps:$4 sm:$0xff]  }
  0x27   :  { %854 = vmatpush1.bf16.msra.mxu0 %v1792_v38  ;;  %940 = vmatpush1.bf16.msra.mxu1 %v1793_v39  ;;  %v1884_v38 = vld [vmem:[%s2729_s1 + $0x308] ss:$16 sps:$4 sm:$0xff]   ;;  %v1889_v39 = vld [vmem:[%s2729_s1 + $0x324] ss:$16 sps:$4 sm:$0xff]  }
  0x28   :  { %855 = vmatprep.subr.bf16.mxu0 %v1794_v40  ;;  %941 = vmatprep.subr.bf16.mxu1 %v1796_v41  ;;  %v1892_v40 = vld [vmem:[%s2729_s1 + $0x32c] ss:$16 sps:$4 sm:$0xff]   ;;  %v1887_v41 = vld [vmem:[%s2729_s1 + $0x320] ss:$16 sps:$4 sm:$0xff]  }
  0x2b   :  { %856 = vmatpush1.bf16.msra.mxu0 %v1798_v42  ;;  %942 = vmatpush1.bf16.msra.mxu1 %v1799_v43  ;;  %v1890_v42 = vld [vmem:[%s2729_s1 + $0x328] ss:$16 sps:$4 sm:$0xff]   ;;  %v1895_v43 = vld [vmem:[%s2729_s1 + $0x344] ss:$16 sps:$4 sm:$0xff]  }
  0x2c   :  { %857 = vmatprep.subr.bf16.mxu0 %v1800_v44  ;;  %943 = vmatprep.subr.bf16.mxu1 %v1802_v45  ;;  %v1898_v44 = vld [vmem:[%s2729_s1 + $0x34c] ss:$16 sps:$4 sm:$0xff]   ;;  %v1893_v45 = vld [vmem:[%s2729_s1 + $0x340] ss:$16 sps:$4 sm:$0xff]  }
  0x2f   :  { %858 = vmatpush1.bf16.msra.mxu0 %v1804_v46  ;;  %944 = vmatpush1.bf16.msra.mxu1 %v1805_v47  ;;  %v1896_v46 = vld [vmem:[%s2729_s1 + $0x348] ss:$16 sps:$4 sm:$0xff]   ;;  %v1901_v47 = vld [vmem:[%s2729_s1 + $0x364] ss:$16 sps:$4 sm:$0xff]  }
  0x30   :  { %859 = vmatprep.subr.bf16.mxu0 %v1806_v49  ;;  %945 = vmatprep.subr.bf16.mxu1 %v1808_v50  ;;  %v1899_v49 = vld [vmem:[%s2729_s1 + $0x360] ss:$16 sps:$4 sm:$0xff]   ;;  %v1902_v50 = vld [vmem:[%s2729_s1 + $0x368] ss:$16 sps:$4 sm:$0xff]  }
  0x33   :  { %860 = vmatpush1.bf16.msra.mxu0 %v1810_v51  ;;  %946 = vmatpush1.bf16.msra.mxu1 %v1811_v52  ;;  %v1907_v51 = vld [vmem:[%s2729_s1 + $0x384] ss:$16 sps:$4 sm:$0xff]   ;;  %v1910_v52 = vld [vmem:[%s2729_s1 + $0x38c] ss:$16 sps:$4 sm:$0xff]  }
  0x34   :  { %861 = vmatprep.subr.bf16.mxu0 %v1812_v53  ;;  %947 = vmatprep.subr.bf16.mxu1 %v1814_v54  ;;  %v1905_v53 = vld [vmem:[%s2729_s1 + $0x380] ss:$16 sps:$4 sm:$0xff]   ;;  %v1908_v54 = vld [vmem:[%s2729_s1 + $0x388] ss:$16 sps:$4 sm:$0xff]  }
  0x37   :  { %862 = vmatpush1.bf16.msra.mxu0 %v1816_v55  ;;  %948 = vmatpush1.bf16.msra.mxu1 %v1817_v56  ;;  %v1913_v55 = vld [vmem:[%s2729_s1 + $0x3a4] ss:$16 sps:$4 sm:$0xff]   ;;  %v1916_v56 = vld [vmem:[%s2729_s1 + $0x3ac] ss:$16 sps:$4 sm:$0xff]  }
  0x38   :  { %863 = vmatprep.subr.bf16.mxu0 %v1818_v57  ;;  %949 = vmatprep.subr.bf16.mxu1 %v1820_v58  ;;  %v1911_v57 = vld [vmem:[%s2729_s1 + $0x3a0] ss:$16 sps:$4 sm:$0xff]   ;;  %v1914_v58 = vld [vmem:[%s2729_s1 + $0x3a8] ss:$16 sps:$4 sm:$0xff]  }
  0x3b   :  { %864 = vmatpush1.bf16.msra.mxu0 %v1822_v59  ;;  %950 = vmatpush1.bf16.msra.mxu1 %v1823_v60  ;;  %v1919_v59 = vld [vmem:[%s2729_s1 + $0x3c4] ss:$16 sps:$4 sm:$0xff]   ;;  %v1922_v60 = vld [vmem:[%s2729_s1 + $0x3cc] ss:$16 sps:$4 sm:$0xff]  }
  0x3c   :  { %865 = vmatprep.subr.bf16.mxu0 %v1824_v61  ;;  %951 = vmatprep.subr.bf16.mxu1 %v1826_v62  ;;  %v1917_v61 = vld [vmem:[%s2729_s1 + $0x3c0] ss:$16 sps:$4 sm:$0xff]   ;;  %v1920_v62 = vld [vmem:[%s2729_s1 + $0x3c8] ss:$16 sps:$4 sm:$0xff]  }
  0x3f   :  { %866 = vmatpush1.bf16.msra.mxu0 %v1828_v63  ;;  %952 = vmatpush1.bf16.msra.mxu1 %v1829_v0  ;;  %v1925_v63 = vld [vmem:[%s2729_s1 + $0x3e4] ss:$16 sps:$4 sm:$0xff]   ;;  %v1928_v0 = vld [vmem:[%s2729_s1 + $0x3ec] ss:$16 sps:$4 sm:$0xff]  }
  0x40   :  { %878 = vmatprep.subr.bf16.mxu0 %v1835_v1  ;;  %964 = vmatprep.subr.bf16.mxu1 %v1838_v2  ;;  %v1923_v1 = vld [vmem:[%s2729_s1 + $0x3e0] ss:$16 sps:$4 sm:$0xff]   ;;  %v1926_v2 = vld [vmem:[%s2729_s1 + $0x3e8] ss:$16 sps:$4 sm:$0xff]  }
  0x42   :  { %868 = vmatmul.mubr.bf16.vlgmr.msra.gmra.mrb[0].mxu0 %v1830_v3  ;;  %954 = vmatmul.mubr.bf16.vlgmr.msra.gmra.mrb[0].mxu1 %v1830_v3  ;;  %v1929_v3 = vld [vmem:[%s2730_s0 + $0x8] ss:$16 sps:$4 sm:$0xff]  }
  0x43   :  { %879 = vmatpush1.bf16.msra.mxu0 %v1833_v4  ;;  %965 = vmatpush1.bf16.msra.mxu1 %v1836_v5  ;;  %v1239_v4 = vld [vmem:[%s2731_s3 + $0x80] sm:$0xff]  ;;  %v1240_v5 = vld [vmem:[%s2731_s3 + $0x88] sm:$0xff] }
  0x44   :  { %880 = vmatprep.subr.bf16.mxu0 %v1841_v6  ;;  %966 = vmatprep.subr.bf16.mxu1 %v1844_v7  ;;  %v1271_v6 = vld [vmem:[%s2731_s3 + $0x180] sm:$0xff]  ;;  %v1653_v7 = vpack.c.bf16 %v1240_v5, %v1239_v4  ;;  %v1282_v4 = vld [vmem:[%s2731_s3 + $0x1d8] sm:$0xff]  ;;  %v1233_v5 = vld [vmem:[%s2731_s3 + $0x50] sm:$0xff] }
  0x45   :  { %910 = vmatprep.mubr.bf16.mxu0 %v1931_v28  ;;  %996 = vmatprep.mubr.bf16.mxu1 %v1931_v28  ;;  %v1243_v28 = vld [vmem:[%s2731_s3 + $0xa0] sm:$0xff] }
  0x47   :  { %881 = vmatpush1.bf16.msra.mxu0 %v1839_v8  ;;  %967 = vmatpush1.bf16.msra.mxu1 %v1842_v9  ;;  %v1272_v8 = vld [vmem:[%s2731_s3 + $0x188] sm:$0xff]  ;;  %v1223_v9 = vld [vmem:[%s2731_s3] sm:$0xff] }
  0x48   :  { %882 = vmatprep.subr.bf16.mxu0 %v1847_v10  ;;  %968 = vmatprep.subr.bf16.mxu1 %v1850_v11  ;;  %v1224_v10 = vld [vmem:[%s2731_s3 + $0x8] sm:$0xff]  ;;  %v1685_v11 = vpack.c.bf16 %v1272_v8, %v1271_v6  ;;  %v1265_v8 = vld [vmem:[%s2731_s3 + $0x150] sm:$0xff] }
  0x4b   :  { %883 = vmatpush1.bf16.msra.mxu0 %v1845_v12  ;;  %969 = vmatpush1.bf16.msra.mxu1 %v1848_v13  ;;  %v1655_v12 = vpack.c.bf16 %v1224_v10, %v1223_v9  ;;  %v1255_v13 = vld [vmem:[%s2731_s3 + $0x100] sm:$0xff]  ;;  %v1266_v9 = vld [vmem:[%s2731_s3 + $0x158] sm:$0xff] }
  0x4c   :  { %884 = vmatprep.subr.bf16.mxu0 %v1853_v14  ;;  %970 = vmatprep.subr.bf16.mxu1 %v1856_v15  ;;  %v1256_v14 = vld [vmem:[%s2731_s3 + $0x108] sm:$0xff] }
  0x4d   :  { %v1687_v15 = vpack.c.bf16 %v1256_v14, %v1255_v13  ;;  %v1283_v13 = vld [vmem:[%s2731_s3 + $0x1e0] sm:$0xff]  ;;  %v1707_v14 = vpack.c.bf16 %v1266_v9, %v1265_v8 }
  0x4f   :  { %885 = vmatpush1.bf16.msra.mxu0 %v1851_v16  ;;  %971 = vmatpush1.bf16.msra.mxu1 %v1854_v17  ;;  %v1241_v16 = vld [vmem:[%s2731_s3 + $0x90] sm:$0xff]  ;;  %v1242_v17 = vld [vmem:[%s2731_s3 + $0x98] sm:$0xff] }
  0x50   :  { %886 = vmatprep.subr.bf16.mxu0 %v1859_v18  ;;  %972 = vmatprep.subr.bf16.mxu1 %v1862_v19  ;;  %v1273_v18 = vld [vmem:[%s2731_s3 + $0x190] sm:$0xff]  ;;  %v1657_v19 = vpack.c.bf16 %v1242_v17, %v1241_v16  ;;  %v1284_v16 = vld [vmem:[%s2731_s3 + $0x1e8] sm:$0xff]  ;;  %v1235_v17 = vld [vmem:[%s2731_s3 + $0x60] sm:$0xff] }
  0x53   :  { %887 = vmatpush1.bf16.msra.mxu0 %v1857_v20  ;;  %973 = vmatpush1.bf16.msra.mxu1 %v1860_v21  ;;  %v1274_v20 = vld [vmem:[%s2731_s3 + $0x198] sm:$0xff]  ;;  %v1225_v21 = vld [vmem:[%s2731_s3 + $0x10] sm:$0xff] }
  0x54   :  { %888 = vmatprep.subr.bf16.mxu0 %v1865_v22  ;;  %974 = vmatprep.subr.bf16.mxu1 %v1868_v23  ;;  %v1226_v22 = vld [vmem:[%s2731_s3 + $0x18] sm:$0xff]  ;;  %v1689_v23 = vpack.c.bf16 %v1274_v20, %v1273_v18  ;;  %v1236_v18 = vld [vmem:[%s2731_s3 + $0x68] sm:$0xff]  ;;  %v1267_v20 = vld [vmem:[%s2731_s3 + $0x160] sm:$0xff] }
  0x57   :  { %889 = vmatpush1.bf16.msra.mxu0 %v1863_v24  ;;  %975 = vmatpush1.bf16.msra.mxu1 %v1866_v25  ;;  %v1659_v24 = vpack.c.bf16 %v1226_v22, %v1225_v21  ;;  %v1257_v25 = vld [vmem:[%s2731_s3 + $0x110] sm:$0xff]  ;;  %v1268_v21 = vld [vmem:[%s2731_s3 + $0x168] sm:$0xff] }
  0x58   :  { %890 = vmatprep.subr.bf16.mxu0 %v1871_v26  ;;  %976 = vmatprep.subr.bf16.mxu1 %v1874_v27  ;;  %v1258_v26 = vld [vmem:[%s2731_s3 + $0x118] sm:$0xff]  ;;  %v1253_v22 = vld [vmem:[%s2731_s3 + $0xf0] sm:$0xff] }
  0x59   :  { %v1691_v27 = vpack.c.bf16 %v1258_v26, %v1257_v25  ;;  %v1286_v25 = vld [vmem:[%s2731_s3 + $0x1f8] sm:$0xff]  ;;  %v1679_v26 = vpack.c.bf16 %v1236_v18, %v1235_v17 }
  0x5b   :  { %891 = vmatpush1.bf16.msra.mxu0 %v1869_v29  ;;  %977 = vmatpush1.bf16.msra.mxu1 %v1872_v30  ;;  %v1244_v29 = vld [vmem:[%s2731_s3 + $0xa8] sm:$0xff]  ;;  %v1275_v30 = vld [vmem:[%s2731_s3 + $0x1a0] sm:$0xff] }
  0x5c   :  { %892 = vmatprep.subr.bf16.mxu0 %v1877_v31  ;;  %978 = vmatprep.subr.bf16.mxu1 %v1880_v32  ;;  %v1661_v31 = vpack.c.bf16 %v1244_v29, %v1243_v28  ;;  %v1276_v32 = vld [vmem:[%s2731_s3 + $0x1a8] sm:$0xff]  ;;  %v1237_v29 = vld [vmem:[%s2731_s3 + $0x70] sm:$0xff] }
  0x5f   :  { %893 = vmatpush1.bf16.msra.mxu0 %v1875_v33  ;;  %979 = vmatpush1.bf16.msra.mxu1 %v1878_v34  ;;  %v1227_v33 = vld [vmem:[%s2731_s3 + $0x20] sm:$0xff]  ;;  %v1228_v34 = vld [vmem:[%s2731_s3 + $0x28] sm:$0xff] }
  0x60   :  { %894 = vmatprep.subr.bf16.mxu0 %v1883_v35  ;;  %980 = vmatprep.subr.bf16.mxu1 %v1886_v36  ;;  %v1693_v35 = vpack.c.bf16 %v1276_v32, %v1275_v30  ;;  %v1663_v36 = vpack.c.bf16 %v1228_v34, %v1227_v33  ;;  %v1238_v30 = vld [vmem:[%s2731_s3 + $0x78] sm:$0xff]  ;;  %v1269_v32 = vld [vmem:[%s2731_s3 + $0x170] sm:$0xff] }
  0x61   :  { %v1270_v33 = vld [vmem:[%s2731_s3 + $0x178] sm:$0xff]  ;;  %v1683_v34 = vpack.c.bf16 %v1238_v30, %v1237_v29 }
  0x63   :  { %895 = vmatpush1.bf16.msra.mxu0 %v1881_v37  ;;  %981 = vmatpush1.bf16.msra.mxu1 %v1884_v38  ;;  %v1259_v37 = vld [vmem:[%s2731_s3 + $0x120] sm:$0xff]  ;;  %v1260_v38 = vld [vmem:[%s2731_s3 + $0x128] sm:$0xff] }
  0x64   :  { %896 = vmatprep.subr.bf16.mxu0 %v1889_v39  ;;  %982 = vmatprep.subr.bf16.mxu1 %v1892_v40  ;;  %v1695_v39 = vpack.c.bf16 %v1260_v38, %v1259_v37  ;;  %v1245_v40 = vld [vmem:[%s2731_s3 + $0xb0] sm:$0xff] }
  0x67   :  { %897 = vmatpush1.bf16.msra.mxu0 %v1887_v41  ;;  %983 = vmatpush1.bf16.msra.mxu1 %v1890_v42  ;;  %v1246_v41 = vld [vmem:[%s2731_s3 + $0xb8] sm:$0xff]  ;;  %v1277_v42 = vld [vmem:[%s2731_s3 + $0x1b0] sm:$0xff] }
  0x68   :  { %898 = vmatprep.subr.bf16.mxu0 %v1895_v43  ;;  %984 = vmatprep.subr.bf16.mxu1 %v1898_v44  ;;  %v1665_v43 = vpack.c.bf16 %v1246_v41, %v1245_v40  ;;  %v1278_v44 = vld [vmem:[%s2731_s3 + $0x1b8] sm:$0xff]  ;;  %v153_v40 = vld [vmem:[%s2732_s2] sm:$0xf] }
  0x6b   :  { %899 = vmatpush1.bf16.msra.mxu0 %v1893_v45  ;;  %985 = vmatpush1.bf16.msra.mxu1 %v1896_v46  ;;  %v1229_v45 = vld [vmem:[%s2731_s3 + $0x30] sm:$0xff]  ;;  %v1230_v46 = vld [vmem:[%s2731_s3 + $0x38] sm:$0xff] }
  0x6c   :  { %900 = vmatprep.subr.bf16.mxu0 %v1901_v47  ;;  %986 = vmatprep.subr.bf16.mxu1 %v1904_v48  ;;  %v1697_v47 = vpack.c.bf16 %v1278_v44, %v1277_v42  ;;  %v1667_v48 = vpack.c.bf16 %v1230_v46, %v1229_v45 }
  0x6f   :  { %901 = vmatpush1.bf16.msra.mxu0 %v1899_v49  ;;  %987 = vmatpush1.bf16.msra.mxu1 %v1902_v50  ;;  %v1261_v49 = vld [vmem:[%s2731_s3 + $0x130] sm:$0xff]  ;;  %v1262_v50 = vld [vmem:[%s2731_s3 + $0x138] sm:$0xff] }
  0x70   :  { %902 = vmatprep.subr.bf16.mxu0 %v1907_v51  ;;  %988 = vmatprep.subr.bf16.mxu1 %v1910_v52  ;;  %v1247_v51 = vld [vmem:[%s2731_s3 + $0xc0] sm:$0xff]  ;;  %v1699_v52 = vpack.c.bf16 %v1262_v50, %v1261_v49 }
  0x73   :  { %903 = vmatpush1.bf16.msra.mxu0 %v1905_v53  ;;  %989 = vmatpush1.bf16.msra.mxu1 %v1908_v54  ;;  %v1248_v53 = vld [vmem:[%s2731_s3 + $0xc8] sm:$0xff]  ;;  %v1279_v54 = vld [vmem:[%s2731_s3 + $0x1c0] sm:$0xff] }
  0x74   :  { %904 = vmatprep.subr.bf16.mxu0 %v1913_v55  ;;  %990 = vmatprep.subr.bf16.mxu1 %v1916_v56  ;;  %v1280_v55 = vld [vmem:[%s2731_s3 + $0x1c8] sm:$0xff]  ;;  %v1669_v56 = vpack.c.bf16 %v1248_v53, %v1247_v51 }
  0x77   :  { %905 = vmatpush1.bf16.msra.mxu0 %v1911_v57  ;;  %991 = vmatpush1.bf16.msra.mxu1 %v1914_v58  ;;  %v1701_v57 = vpack.c.bf16 %v1280_v55, %v1279_v54  ;;  %v1231_v58 = vld [vmem:[%s2731_s3 + $0x40] sm:$0xff] }
  0x78   :  { %906 = vmatprep.subr.bf16.mxu0 %v1919_v59  ;;  %992 = vmatprep.subr.bf16.mxu1 %v1922_v60  ;;  %v1232_v59 = vld [vmem:[%s2731_s3 + $0x48] sm:$0xff]  ;;  %v1263_v60 = vld [vmem:[%s2731_s3 + $0x140] sm:$0xff] }
  0x7b   :  { %907 = vmatpush1.bf16.msra.mxu0 %v1917_v61  ;;  %993 = vmatpush1.bf16.msra.mxu1 %v1920_v62  ;;  %v1671_v61 = vpack.c.bf16 %v1232_v59, %v1231_v58  ;;  %v1264_v62 = vld [vmem:[%s2731_s3 + $0x148] sm:$0xff] }
  0x7c   :  { %908 = vmatprep.subr.bf16.mxu0 %v1925_v63  ;;  %994 = vmatprep.subr.bf16.mxu1 %v1928_v0  ;;  %v1249_v63 = vld [vmem:[%s2731_s3 + $0xd0] sm:$0xff]  ;;  %v1250_v0 = vld [vmem:[%s2731_s3 + $0xd8] sm:$0xff] }
  0x7f   :  { %909 = vmatpush1.bf16.msra.mxu0 %v1923_v1  ;;  %995 = vmatpush1.bf16.msra.mxu1 %v1926_v2  ;;  %v1703_v1 = vpack.c.bf16 %v1264_v62, %v1263_v60  ;;  %v1673_v2 = vpack.c.bf16 %v1250_v0, %v1249_v63 }
  0x80   :  { %1654 = vmatprep.subr.bf16.mxu0 %v1653_v7  ;;  %1686 = vmatprep.subr.bf16.mxu1 %v1685_v11  ;;  %v1234_v7 = vld [vmem:[%s2731_s3 + $0x58] sm:$0xff]  ;;  %v1251_v11 = vld [vmem:[%s2731_s3 + $0xe0] sm:$0xff] }
  0x81   :  { %v1675_v10 = vpack.c.bf16 %v1234_v7, %v1233_v5 }
  0x82   :  { %911 = vmatmul.mubr.bf16.vlgmr.msra.gmra.mrb[0].mxu0 %v1929_v3  ;;  %997 = vmatmul.mubr.bf16.vlgmr.msra.gmra.mrb[0].mxu1 %v1929_v3  ;;  %v1281_v3 = vld [vmem:[%s2731_s3 + $0x1d0] sm:$0xff] }
  0x83   :  { %1656 = vmatpush3.bf16.msra.mxu0 %v1655_v12  ;;  %1688 = vmatpush3.bf16.msra.mxu1 %v1687_v15  ;;  %v1705_v6 = vpack.c.bf16 %v1282_v4, %v1281_v3  ;;  %v1252_v12 = vld [vmem:[%s2731_s3 + $0xe8] sm:$0xff] }
  0x84   :  { %1658 = vmatprep.subr.bf16.mxu0 %v1657_v19  ;;  %1690 = vmatprep.subr.bf16.mxu1 %v1689_v23  ;;  %v1677_v15 = vpack.c.bf16 %v1252_v12, %v1251_v11  ;;  %v1709_v19 = vpack.c.bf16 %v1284_v16, %v1283_v13  ;;  %v1254_v23 = vld [vmem:[%s2731_s3 + $0xf8] sm:$0xff] }
  0x85   :  { %v1681_v28 = vpack.c.bf16 %v1254_v23, %v1253_v22 }
  0x87   :  { %1660 = vmatpush3.bf16.msra.mxu0 %v1659_v24  ;;  %1692 = vmatpush3.bf16.msra.mxu1 %v1691_v27  ;;  %v1285_v24 = vld [vmem:[%s2731_s3 + $0x1f0] sm:$0xff]  ;;  %v1711_v27 = vpack.c.bf16 %v1268_v21, %v1267_v20 }
  0x88   :  { %1662 = vmatprep.subr.bf16.mxu0 %v1661_v31  ;;  %1694 = vmatprep.subr.bf16.mxu1 %v1693_v35  ;;  %v1713_v31 = vpack.c.bf16 %v1286_v25, %v1285_v24  ;;  %v1715_v35 = vpack.c.bf16 %v1270_v33, %v1269_v32 }
  0x8b   :  { %1664 = vmatpush3.bf16.msra.mxu0 %v1663_v36  ;;  %1696 = vmatpush3.bf16.msra.mxu1 %v1695_v39  ;;  %v155_v36 = vlaneseq }
  0x8c   :  { %1666 = vmatprep.subr.bf16.mxu0 %v1665_v43  ;;  %1698 = vmatprep.subr.bf16.mxu1 %v1697_v47 }
  0x8d   :  { %v156_v37 = vshrl.u32 %v155_v36, 7 }
  0x8f   :  { %1668 = vmatpush3.bf16.msra.mxu0 %v1667_v48  ;;  %1700 = vmatpush3.bf16.msra.mxu1 %v1699_v52  ;;  %v157_v38 = vsub.s32 0, %v156_v37  ;;  %v165_v39 = vsub.s32 2, %v156_v37  ;;  %v161_v41 = vsub.s32 1, %v156_v37  ;;  %v169_v42 = vsub.s32 3, %v156_v37 }
  0x90   :  { %1670 = vmatprep.subr.bf16.mxu0 %v1669_v56  ;;  %1702 = vmatprep.subr.bf16.mxu1 %v1701_v57 }
  0x91   :  { %v158_v43 = vrot.slane %v153_v40, %v157_v38  ;;  %v166_v44 = vrot.slane %v153_v40, %v165_v39  ;;  %v162_v45 = vrot.slane %v153_v40, %v161_v41  ;;  %v170_v46 = vrot.slane %v153_v40, %v169_v42 }
  0x93   :  { %1672 = vmatpush3.bf16.msra.mxu0 %v1671_v61  ;;  %1704 = vmatpush3.bf16.msra.mxu1 %v1703_v1 }
  0x94   :  { %1674 = vmatprep.subr.bf16.mxu0 %v1673_v2  ;;  %1706 = vmatprep.subr.bf16.mxu1 %v1705_v6 }
  0x97   :  { %1676 = vmatpush3.bf16.msra.mxu0 %v1675_v10  ;;  %1708 = vmatpush3.bf16.msra.mxu1 %v1707_v14 }
  0x98   :  { %1678 = vmatprep.subr.bf16.mxu0 %v1677_v15  ;;  %1710 = vmatprep.subr.bf16.mxu1 %v1709_v19 }
  0x9b   :  { %1680 = vmatpush3.bf16.msra.mxu0 %v1679_v26  ;;  %1712 = vmatpush3.bf16.msra.mxu1 %v1711_v27 }
  0x9c   :  { %1682 = vmatprep.subr.bf16.mxu0 %v1681_v28  ;;  %1714 = vmatprep.subr.bf16.mxu1 %v1713_v31  ;;  %v1964_v31 = vmov -1.0  }
  0x9f   :  { %1684 = vmatpush3.bf16.msra.mxu0 %v1683_v34  ;;  %1716 = vmatpush3.bf16.msra.mxu1 %v1715_v35 }
 0x155   :  { %v912_v47 = vpop.f32.mrb[0].mxu0  ;;  %v998_v48 = vpop.f32.mrb[0].mxu1 }
 0x156   :  { %v1717_v49 = vadd.f32 %v912_v47, %v158_v43  ;;  %v2586_v50 = vadd.f32 %v998_v48, %v166_v44  ;;  %v914_v51 = vpop.f32.mrb[1].mxu0  ;;  %v1000_v52 = vpop.f32.mrb[1].mxu1 }
 0x157   :  { %v1718_v53 = vadd.f32 %v914_v51, %v162_v45  ;;  %v1722_v54 = vadd.f32 %v1000_v52, %v170_v46  ;;  %v916_v55 = vpop.f32.mrb[2].mxu0  ;;  %v1002_v56 = vpop.f32.mrb[2].mxu1 }
 0x158   :  { %v1015_v57 = vmul.f32 0.70710677, %v1717_v49  ;;  %v1017_v58 = vmul.f32 0.70710677, %v2586_v50  ;;  %v918_v0 = vpop.f32.mrb[3].mxu0  ;;  %v1004_v4 = vpop.f32.mrb[3].mxu1  ;;  %v2595_v9 = vadd.f32 %v916_v55, %v158_v43  ;;  %v2600_v13 = vadd.f32 %v1002_v56, %v166_v44 }
 0x159   :  { %v2589_v59 = vmul.f32 0.70710677, %v1718_v53  ;;  %v2592_v63 = vmul.f32 0.70710677, %v1722_v54  ;;  %v2602_v15 = vadd.f32 %v918_v0, %v162_v45  ;;  %v2605_v18 = vmul.f32 0.5, %v1717_v49 }
 0x15a   :  { %v1039_v60 = vand.u32 2147483647, %v1015_v57  ;;  %v1041_v61 = vand.u32 2147483647, %v1017_v58  ;;  %v2598_v12 = vmul.f32 0.70710677, %v2595_v9  ;;  %v2618_v30 = vadd.f32 %v1004_v4, %v170_v46 }
 0x15b   :  { %v1040_v62 = vand.u32 2147483647, %v2589_v59  ;;  %v1042_v7 = vand.u32 2147483647, %v2592_v63  ;;  %vm1023_vm0 = vcmp.ge.f32.partialorder %v1015_v57, 0.0  ;;  %vm1025_vm1 = vcmp.ge.f32.partialorder %v1017_v58, 0.0 }
 0x15c   :  { %v1047_v1 = vmul.f32 0.3275911, %v1039_v60  ;;  %v1049_v2 = vmul.f32 0.3275911, %v1041_v61  ;;  %v1151_v11 = vsub.f32 0.0, %v1039_v60  ;;  %v1153_v16 = vsub.f32 0.0, %v1041_v61 }
 0x15d   :  { %v1048_v3 = vmul.f32 0.3275911, %v1040_v62  ;;  %v1050_v10 = vmul.f32 0.3275911, %v1042_v7  ;;  %v1043_v17 = vand.u32 2147483647, %v2598_v12 }
 0x15e   :  { %v1055_v5 = vadd.f32 1.0, %v1047_v1  ;;  %v1057_v6 = vadd.f32 1.0, %v1049_v2  ;;  %v2608_v19 = vmul.f32 0.70710677, %v2600_v13  ;;  %v1159_v20 = vmul.f32 %v1151_v11, %v1039_v60 }
 0x15f   :  { %v1056_v8 = vadd.f32 1.0, %v1048_v3  ;;  %v1058_v14 = vadd.f32 1.0, %v1050_v10  ;;  %v1152_v21 = vsub.f32 0.0, %v1040_v62  ;;  %v1051_v22 = vmul.f32 0.3275911, %v1043_v17 }
 0x160   :  { %1932 = vrcp.f32 %v1055_v5  ;;  %v2610_v23 = vmul.f32 0.5, %v1718_v53  ;;  %v2612_v24 = vmul.f32 0.5, %v1722_v54  ;;  %v1045_v25 = vand.u32 2147483647, %v2608_v19 }
 0x161   :  { %1934 = vrcp.f32 %v1057_v6  ;;  %v2616_v26 = vmul.f32 0.70710677, %v2602_v15  ;;  %v1161_v27 = vmul.f32 %v1153_v16, %v1041_v61  ;;  %v1154_v28 = vsub.f32 0.0, %v1042_v7 }
 0x162   :  { %1936 = vrcp.f32 %v1056_v8  ;;  %v1059_v29 = vadd.f32 1.0, %v1051_v22  ;;  %v2622_v32 = vsel %vm1023_vm0, 1.0, %v1964_v31  ;;  %v2626_v33 = vsel %vm1025_vm1, 1.0, %v1964_v31 }
 0x163   :  { %1938 = vrcp.f32 %v1058_v14  ;;  %v1053_v34 = vmul.f32 0.3275911, %v1045_v25  ;;  %v1044_v35 = vand.u32 2147483647, %v2616_v26  ;;  %v1167_v37 = vmul.f32 1.442695, %v1159_v20 }
 0x164   :  { %vm1024_vm2 = vcmp.ge.f32.partialorder %v2589_v59, 0.0  ;;  %v1160_v38 = vmul.f32 %v1152_v21, %v1040_v62  ;;  %1940 = vrcp.f32 %v1059_v29  ;;  %v1155_v41 = vsub.f32 0.0, %v1043_v17 }
 0x165   :  { %v1061_v42 = vadd.f32 1.0, %v1053_v34  ;;  %v1052_v43 = vmul.f32 0.3275911, %v1044_v35  ;;  %v1171_v45 = vmul.f32 1.442695, %v1161_v27  ;;  %v1162_v46 = vmul.f32 %v1154_v28, %v1042_v7 }
 0x166   :  { %v2637_v47 = vmul.f32 0.70710677, %v2618_v30  ;;  %v1157_v49 = vsub.f32 0.0, %v1045_v25  ;;  %v1169_v54 = vmul.f32 1.442695, %v1160_v38  ;;  %v1163_v57 = vmul.f32 %v1155_v41, %v1043_v17 }
 0x167   :  { %1942 = vrcp.f32 %v1061_v42  ;;  %v1060_v51 = vadd.f32 1.0, %v1052_v43  ;;  %v1173_v62 = vmul.f32 1.442695, %v1162_v46  ;;  %v1156_v3 = vsub.f32 0.0, %v1044_v35 }
 0x168   :  { %v1046_v55 = vand.u32 2147483647, %v2637_v47  ;;  %1944 = vpow2.f32 %v1167_v37  ;;  %v1165_v2 = vmul.f32 %v1157_v49, %v1045_v25  ;;  %v1175_v10 = vmul.f32 1.442695, %v1163_v57 }
 0x169   :  { %1946 = vrcp.f32 %v1060_v51  ;;  %v2656_v17 = vsel %vm1024_vm2, 1.0, %v1964_v31  ;;  %v1164_v25 = vmul.f32 %v1156_v3, %v1044_v35  ;;  %vm1026_vm3 = vcmp.ge.f32.partialorder %v2592_v63, 0.0 }
 0x16a   :  { %v2629_v36 = vpop.eup %1932  ;;  %v1054_v0 = vmul.f32 0.3275911, %v1046_v55  ;;  %1948 = vpow2.f32 %v1171_v45  ;;  %v1179_v22 = vmul.f32 1.442695, %v1165_v2  ;;  %v1158_v59 = vsub.f32 0.0, %v1046_v55 }
 0x16b   :  { %v2632_v39 = vpop.eup %1934  ;;  %v1079_v40 = vmul.f32 1.0614054, %v2629_v36  ;;  %1950 = vpow2.f32 %v1169_v54  ;;  %v1177_v46 = vmul.f32 1.442695, %v1164_v25  ;;  %vm1027_vm4 = vcmp.ge.f32.partialorder %v2598_v12, 0.0 }
 0x16c   :  { %v1081_v44 = vmul.f32 1.0614054, %v2632_v39  ;;  %v2639_v52 = vpop.eup %1936  ;;  %v1062_v6 = vadd.f32 1.0, %v1054_v0  ;;  %vm1028_vm5 = vcmp.ge.f32.partialorder %v2616_v26, 0.0  ;;  %vm1029_vm6 = vcmp.ge.f32.partialorder %v2608_v19, 0.0 }
 0x16d   :  { %v1087_v48 = vadd.f32 -1.4531521, %v1079_v40  ;;  %v1080_v58 = vmul.f32 1.0614054, %v2639_v52  ;;  %v2644_v60 = vpop.eup %1938  ;;  %v1036_v12 = vsel %vm1028_vm5, 1.0, %v1964_v31  ;;  %vm1030_vm7 = vcmp.ge.f32.partialorder %v2637_v47, 0.0 }
 0x16e   :  { %v1089_v53 = vadd.f32 -1.4531521, %v1081_v44  ;;  %v1082_v7 = vmul.f32 1.0614054, %v2644_v60  ;;  %v2650_v14 = vpop.eup %1940  ;;  %1952 = vrcp.f32 %v1062_v6 }
 0x16f   :  { %v1095_v56 = vmul.f32 %v2629_v36, %v1087_v48  ;;  %v1088_v4 = vadd.f32 -1.4531521, %v1080_v58  ;;  %1954 = vpow2.f32 %v1173_v62  ;;  %v1083_v34 = vmul.f32 1.0614054, %v2650_v14 }
 0x170   :  { %v1097_v61 = vmul.f32 %v2632_v39, %v1089_v53  ;;  %v1090_v20 = vadd.f32 -1.4531521, %v1082_v7  ;;  %1956 = vpow2.f32 %v1175_v10  ;;  %v1166_v58 = vmul.f32 %v1158_v59, %v1046_v55 }
 0x171   :  { %v1103_v1 = vadd.f32 1.4214138, %v1095_v56  ;;  %v1096_v11 = vmul.f32 %v2639_v52, %v1088_v4  ;;  %v2660_v37 = vpop.eup %1942  ;;  %v1091_v43 = vadd.f32 -1.4531521, %v1083_v34  ;;  %1958 = vpow2.f32 %v1179_v22 }
 0x172   :  { %v1105_v5 = vadd.f32 1.4214138, %v1097_v61  ;;  %v1098_v29 = vmul.f32 %v2644_v60, %v1090_v20  ;;  %v1085_v35 = vmul.f32 1.0614054, %v2660_v37  ;;  %v1945_v44 = vpop.eup %1944  ;;  %1960 = vpow2.f32 %v1177_v46 }
 0x173   :  { %v1111_v8 = vmul.f32 %v2629_v36, %v1103_v1  ;;  %v1104_v27 = vadd.f32 1.4214138, %v1096_v11  ;;  %v2666_v49 = vpop.eup %1946  ;;  %v1099_v54 = vmul.f32 %v2650_v14, %v1091_v43 }
 0x174   :  { %v1113_v16 = vmul.f32 %v2632_v39, %v1105_v5  ;;  %v1106_v42 = vadd.f32 1.4214138, %v1098_v29  ;;  %v1093_v56 = vadd.f32 -1.4531521, %v1085_v35  ;;  %v1084_v62 = vmul.f32 1.0614054, %v2666_v49  ;;  %v1949_v0 = vpop.eup %1948 }
 0x175   :  { %v1119_v21 = vadd.f32 -0.28449672, %v1111_v8  ;;  %v1112_v40 = vmul.f32 %v2639_v52, %v1104_v27  ;;  %v1107_v3 = vadd.f32 1.4214138, %v1099_v54  ;;  %v1951_v5 = vpop.eup %1950  ;;  %v1181_v27 = vmul.f32 1.442695, %v1166_v58 }
 0x176   :  { %v1121_v28 = vadd.f32 -0.28449672, %v1113_v16  ;;  %v1114_v53 = vmul.f32 %v2644_v60, %v1106_v42  ;;  %v1101_v4 = vmul.f32 %v2660_v37, %v1093_v56  ;;  %v1092_v8 = vadd.f32 -1.4531521, %v1084_v62 }
 0x177   :  { %v1127_v38 = vmul.f32 %v2629_v36, %v1119_v21  ;;  %v1120_v48 = vadd.f32 -0.28449672, %v1112_v40  ;;  %v1115_v11 = vmul.f32 %v2650_v14, %v1107_v3  ;;  %1962 = vpow2.f32 %v1181_v27 }
 0x178   :  { %v1129_v41 = vmul.f32 %v2632_v39, %v1121_v28  ;;  %v1122_v2 = vadd.f32 -0.28449672, %v1114_v53  ;;  %v2675_v10 = vpop.eup %1952  ;;  %v1109_v16 = vadd.f32 1.4214138, %v1101_v4  ;;  %v1100_v21 = vmul.f32 %v2666_v49, %v1092_v8 }
 0x179   :  { %v1135_v45 = vadd.f32 0.2548296, %v1127_v38  ;;  %v1128_v61 = vmul.f32 %v2639_v52, %v1120_v48  ;;  %v1086_v22 = vmul.f32 1.0614054, %v2675_v10  ;;  %v1955_v25 = vpop.eup %1954  ;;  %v1123_v29 = vadd.f32 -0.28449672, %v1115_v11 }
 0x17a   :  { %v1137_v51 = vadd.f32 0.2548296, %v1129_v41  ;;  %v1130_v55 = vmul.f32 %v2644_v60, %v1122_v2  ;;  %v1117_v34 = vmul.f32 %v2660_v37, %v1109_v16  ;;  %v1957_v38 = vpop.eup %1956  ;;  %v1108_v41 = vadd.f32 1.4214138, %v1100_v21 }
 0x17b   :  { %v1143_v57 = vmul.f32 %v2629_v36, %v1135_v45  ;;  %v1136_v7 = vadd.f32 0.2548296, %v1128_v61  ;;  %v1094_v42 = vadd.f32 -1.4531521, %v1086_v22  ;;  %v1959_v45 = vpop.eup %1958  ;;  %v1034_v3 = vsel %vm1026_vm3, 1.0, %v1964_v31 }
 0x17c   :  { %v1145_v1 = vmul.f32 %v2632_v39, %v1137_v51  ;;  %v1138_v28 = vadd.f32 0.2548296, %v1130_v55  ;;  %v1116_v48 = vmul.f32 %v2666_v49, %v1108_v41  ;;  %v1961_v2 = vpop.eup %1960  ;;  %v1012_v41 = vmul.f32 0.5, %v2602_v15 }
 0x17d   :  { %v1183_v6 = vmul.f32 %v1945_v44, %v1143_v57  ;;  %v1144_v39 = vmul.f32 %v2639_v52, %v1136_v7  ;;  %v1131_v52 = vmul.f32 %v2650_v14, %v1123_v29  ;;  %v1125_v44 = vadd.f32 -0.28449672, %v1117_v34 }
 0x17e   :  { %v1185_v36 = vmul.f32 %v1949_v0, %v1145_v1  ;;  %v1146_v35 = vmul.f32 %v2644_v60, %v1138_v28  ;;  %v1102_v51 = vmul.f32 %v2675_v10, %v1094_v42  ;;  %v1124_v57 = vadd.f32 -0.28449672, %v1116_v48 }
 0x17f   :  { %v1191_v20 = vsub.f32 1.0, %v1183_v6  ;;  %v1184_v40 = vmul.f32 %v1951_v5, %v1144_v39  ;;  %v1139_v54 = vadd.f32 0.2548296, %v1131_v52  ;;  %v1133_v56 = vmul.f32 %v2660_v37, %v1125_v44 }
 0x180   :  { %v1193_v59 = vsub.f32 1.0, %v1185_v36  ;;  %v1186_v53 = vmul.f32 %v1955_v25, %v1146_v35  ;;  %v1110_v58 = vadd.f32 1.4214138, %v1102_v51  ;;  %v1132_v5 = vmul.f32 %v2666_v49, %v1124_v57 }
 0x181   :  { %v1199_v43 = vmul.f32 %v1191_v20, %v2622_v32  ;;  %v1192_v46 = vsub.f32 1.0, %v1184_v40  ;;  %v1147_v0 = vmul.f32 %v2650_v14, %v1139_v54  ;;  %v1141_v1 = vadd.f32 0.2548296, %v1133_v56  ;;  %v1963_v28 = vpop.eup %1962 }
 0x182   :  { %v1201_v32 = vmul.f32 %v1193_v59, %v2626_v33  ;;  %v1194_v62 = vsub.f32 1.0, %v1186_v53  ;;  %v1118_v6 = vmul.f32 %v2675_v10, %v1110_v58  ;;  %v1140_v36 = vadd.f32 0.2548296, %v1132_v5 }
 0x183   :  { %v1200_v60 = vmul.f32 %v1192_v46, %v2656_v17  ;;  %v1207_v61 = vadd.f32 1.0, %v1199_v43  ;;  %v1187_v17 = vmul.f32 %v1957_v38, %v1147_v0  ;;  %v1149_v7 = vmul.f32 %v2660_v37, %v1141_v1 }
 0x184   :  { %v1202_v33 = vmul.f32 %v1194_v62, %v1034_v3  ;;  %v1209_v8 = vadd.f32 1.0, %v1201_v32  ;;  %v1126_v55 = vadd.f32 -0.28449672, %v1118_v6  ;;  %v1009_v39 = vmul.f32 0.5, %v2586_v50 }
 0x185   :  { %v1208_v4 = vadd.f32 1.0, %v1200_v60  ;;  %v1215_v11 = vmul.f32 %v1207_v61, %v2605_v18  ;;  %v1195_v16 = vsub.f32 1.0, %v1187_v17  ;;  %v1189_v20 = vmul.f32 %v1959_v45, %v1149_v7 }
 0x186   :  { %v1210_v63 = vadd.f32 1.0, %v1202_v33  ;;  %v1148_v21 = vmul.f32 %v2666_v49, %v1140_v36  ;;  %v1134_v22 = vmul.f32 %v2675_v10, %v1126_v55  ;;  %v1035_v37 = vsel %vm1027_vm4, 1.0, %v1964_v31 }
 0x187   :  { %v1216_v14 = vmul.f32 %v1208_v4, %v2610_v23  ;;  %v1217_v25 = vmul.f32 %v1209_v8, %v1009_v39  ;;  %v1203_v50 = vmul.f32 %v1195_v16, %v1035_v37  ;;  %v1197_v49 = vsub.f32 1.0, %v1189_v20 }
 0x188   :  { %v1218_v23 = vmul.f32 %v1210_v63, %v2612_v24  ;;  %v1188_v18 = vmul.f32 %v1961_v2, %v1148_v21  ;;  %v1142_v27 = vadd.f32 0.2548296, %v1134_v22  ;;  %v1037_v24 = vsel %vm1029_vm6, 1.0, %v1964_v31 }
 0x189   :  { %1353 = vmatprep.mubr.f32.mxu0 %v1216_v14  ;;  %v1211_v59 = vadd.f32 1.0, %v1203_v50  ;;  %v1205_v40 = vmul.f32 %v1197_v49, %v1037_v24  ;;  %v1011_v43 = vmul.f32 0.5, %v2595_v9  ;;  %v1038_v35 = vsel %vm1030_vm7, 1.0, %v1964_v31 }
 0x18a   :  { %1354 = vmatmul.mubr.f32.vlgmr.msra.gmra.mrb[4].mxu0 %v1215_v11  ;;  %1428 = vmatprep.mubr.f32.mxu1 %v1218_v23  ;;  %v1196_v29 = vsub.f32 1.0, %v1188_v18  ;;  %v1150_v34 = vmul.f32 %v2675_v10, %v1142_v27  ;;  %v1014_v46 = vmul.f32 0.5, %v2618_v30  ;;  %v1013_v48 = vmul.f32 0.5, %v2600_v13 }
 0x18b   :  { %1429 = vmatmul.mubr.f32.vlgmr.msra.gmra.mrb[4].mxu1 %v1217_v25  ;;  %v1219_v44 = vmul.f32 %v1211_v59, %v1011_v43  ;;  %v1213_v45 = vadd.f32 1.0, %v1205_v40  ;;  %v1288_v9 = vstv %s2733_s4 }
 0x18c   :  { %v1204_v38 = vmul.f32 %v1196_v29, %v1036_v12  ;;  %v1190_v26 = vmul.f32 %v1963_v28, %v1150_v34 }
 0x18d   :  { %v1221_v53 = vmul.f32 %v1213_v45, %v1013_v48 }
 0x18e   :  { %v1212_v19 = vadd.f32 1.0, %v1204_v38  ;;  %v1198_v42 = vsub.f32 1.0, %v1190_v26 }
 0x190   :  { %v1220_v52 = vmul.f32 %v1212_v19, %v1012_v41  ;;  %v1206_v10 = vmul.f32 %v1198_v42, %v1038_v35 }
 0x192   :  { %1358 = vmatprep.mubr.f32.mxu0 %v1220_v52  ;;  %v1214_v47 = vadd.f32 1.0, %v1206_v10 }
 0x193   :  { %1359 = vmatmul.mubr.f32.gmra.mrb[6].mxu0 %v1219_v44 }
 0x194   :  { %v1222_v51 = vmul.f32 %v1214_v47, %v1014_v46 }
 0x196   :  { %1433 = vmatprep.mubr.f32.mxu1 %v1222_v51 }
 0x197   :  { %1434 = vmatmul.mubr.f32.gmra.mrb[6].mxu1 %v1221_v53 }
 0x25d   :  { %v1609_v15 = vpop.f32.mrb[4].mxu0 }
 0x25e   :  { %v1610_v31 = vpop.f32.mrb[5].mxu0  ;;  %v1647_v56 = vpop.f32.mrb[4].mxu1 }
 0x25f   :  { %v1611_v54 = vadd.f32 %v1610_v31, %v1609_v15  ;;  %v1648_v60 = vpop.f32.mrb[5].mxu1 }
 0x260   :  { %v1649_v30 = vadd.f32 %v1648_v60, %v1647_v56 }
 0x261   :  { %v1356_v32 = vadd.f32 %v1611_v54, %v1288_v9 }
 0x263   :  { %v1431_v57 = vadd.f32 %v1649_v30, %v1356_v32 }
 0x265   :  { %1439 = vst [vmem:[%s2734_s5] sm:$0xff] %v1431_v57 }
 0x266   :  { %v1612_v13 = vpop.f32.mrb[6].mxu0 }
 0x267   :  { %v1613_v58 = vpop.f32.mrb[7].mxu0 }
 0x268   :  { %v1614_v61 = vadd.f32 %v1613_v58, %v1612_v13 }
 0x26a   :  { %v1650_v62 = vpop.f32.mrb[6].mxu1  ;;  %v1361_v0 = vadd.f32 %v1614_v61, %v1288_v9 }
 0x26b   :  { %v1651_v1 = vpop.f32.mrb[7].mxu1 }
 0x26c   :  { %v1652_v2 = vadd.f32 %v1651_v1, %v1650_v62 }
 0x26e   :  { %v1436_v3 = vadd.f32 %v1652_v2, %v1361_v0 }
 0x270   :  { %1440 = vst [vmem:[%s2734_s5 + $0x8] sm:$0xff] %v1436_v3 }

</bundles_post_ra>
